<compile_context>
chip_gen: v6e
topology: v6e:2x2x1
jax: 0.10.0
libtpu: 0.0.40
codegen_flags: <defaults>
</compile_context>

<pallas_src>
import functools
import math

import jax
import jax.numpy as jnp
from jax.experimental import pallas as pl
from jax.experimental.pallas import tpu as pltpu


_NEG_BIG = -1e10          # matches torch masked_fill(mask, -1e10)
_LN_EPS = 1e-5            # torch.nn.LayerNorm default eps
_VMEM_LIMIT = 48 * 1024 * 1024   # above v5e/v6e scoped defaults, below v7x physical


def _pick_tile(n, cap):
    """Largest multiple of 8 <= cap that divides n (else n itself)."""
    if n <= cap:
        return n
    for t in range(cap, 7, -8):
        if n % t == 0:
            return t
    return n


def _layernorm(v, g, b):
    mu = jnp.mean(v, axis=-1, keepdims=True)
    var = jnp.mean((v - mu) ** 2, axis=-1, keepdims=True)
    return (v - mu) * jax.lax.rsqrt(var + _LN_EPS) * g + b


# ---------------------------------------------------------------------------
# Kernel 1: LayerNorm1 + Q/K/V projections, heads split once per row tile.
# ---------------------------------------------------------------------------
def _qkv_kernel(x_ref, g_ref, b_ref,
                wq_ref, bq_ref, wk_ref, bk_ref, wv_ref, bv_ref,
                q_ref, k_ref, v_ref, *, n_heads, head_dim):
    x1 = _layernorm(x_ref[0], g_ref[0], b_ref[0])            # (tp, C) f32
    x1b = x1.astype(wq_ref.dtype)                            # bf16 MXU inputs

    q = jnp.dot(x1b, wq_ref[...], preferred_element_type=jnp.float32) + bq_ref[0]
    k = jnp.dot(x1b, wk_ref[...], preferred_element_type=jnp.float32) + bk_ref[0]
    v = jnp.dot(x1b, wv_ref[...], preferred_element_type=jnp.float32) + bv_ref[0]
    # hoist the 1/sqrt(head_dim) scale out of the attention inner loop
    q = q * jnp.float32(1.0 / math.sqrt(head_dim))

    tp = x1.shape[0]

    def split_heads(t):                                      # (tp, C) -> (H, tp, hd)
        return jnp.transpose(t.reshape(tp, n_heads, head_dim), (1, 0, 2))

    q_ref[0] = split_heads(q).astype(q_ref.dtype)
    k_ref[0] = split_heads(k).astype(k_ref.dtype)
    v_ref[0] = split_heads(v).astype(v_ref.dtype)


# ---------------------------------------------------------------------------
# Kernel 2: flash-style attention + residual + LayerNorm2 + FFN + residual.
# ---------------------------------------------------------------------------
def _attn_ffn_kernel(mask_ref, x_ref, q_ref, k_ref, v_ref,
                     g2_ref, b2_ref, w1_ref, fb1_ref, w2_ref, fb2_ref,
                     o_ref, m_sc, l_sc, acc_sc, *, n_heads, head_dim):
    ki = pl.program_id(2)

    @pl.when(ki == 0)
    def _init():
        m_sc[...] = jnp.full(m_sc.shape, -jnp.inf, dtype=m_sc.dtype)
        l_sc[...] = jnp.zeros(l_sc.shape, dtype=l_sc.dtype)
        acc_sc[...] = jnp.zeros(acc_sc.shape, dtype=acc_sc.dtype)

    # Scores for this kv tile, all heads at once: (H, tq, tkv) f32.
    s = jnp.einsum('hqd,hkd->hqk', q_ref[0], k_ref[0],
                   preferred_element_type=jnp.float32)
    # masked_fill semantics: masked positions are SET to -1e10 (mask broadcast
    # over heads), exactly like the PyTorch reference.
    s = jnp.where(mask_ref[0][None, :, :] != 0, jnp.float32(_NEG_BIG), s)

    m_prev = m_sc[...]
    m_new = jnp.maximum(m_prev, jnp.max(s, axis=-1, keepdims=True))
    alpha = jnp.exp(m_prev - m_new)
    p = jnp.exp(s - m_new)                                   # unnormalized probs
    l_sc[...] = alpha * l_sc[...] + jnp.sum(p, axis=-1, keepdims=True)
    acc_sc[...] = alpha * acc_sc[...] + jnp.einsum(
        'hqk,hkd->hqd', p.astype(v_ref.dtype), v_ref[0],
        preferred_element_type=jnp.float32)
    m_sc[...] = m_new

    @pl.when(ki == pl.num_programs(2) - 1)
    def _finalize():
        # Deferred softmax normalization on the (H, tq, hd) result (EUP recip).
        o = acc_sc[...] * pl.reciprocal(l_sc[...], approx=True)
        tq = o.shape[1]
        o = jnp.transpose(o, (1, 0, 2)).reshape(tq, n_heads * head_dim)

        xr = x_ref[0] + o                                    # residual 1 (f32)

        x2 = _layernorm(xr, g2_ref[0], b2_ref[0])
        h1 = jnp.dot(x2.astype(w1_ref.dtype), w1_ref[...],
                     preferred_element_type=jnp.float32) + fb1_ref[0]
        h1 = jnp.maximum(h1, 0.0)                            # ReLU
        ff = jnp.dot(h1.astype(w2_ref.dtype), w2_ref[...],
                     preferred_element_type=jnp.float32) + fb2_ref[0]

        o_ref[0] = (xr + ff).astype(o_ref.dtype)             # residual 2


def transformer_block(x, mask, params, *, n_heads):
    """Forward pass of `Block` (eval mode).

    x:    (B, T, C) float32
    mask: (T, T) or (B, T, T) int/bool (nonzero == masked position), or None
    """
    B, T, C = x.shape
    assert C % n_heads == 0
    hd = C // n_heads
    (ln1_g, ln1_b, wq, bq, wk, bk, wv, bv,
     ln2_g, ln2_b, w1, b1, w2, b2) = params
    ffn = w1.shape[1]

    bf16 = jnp.bfloat16
    row = lambda p: p.reshape(1, -1).astype(jnp.float32)     # 1-D param -> (1, n)

    # ---------------- Kernel 1: LN1 + QKV projections -----------------------
    tp = _pick_tile(T, 256)
    qkv_call = pl.pallas_call(
        functools.partial(_qkv_kernel, n_heads=n_heads, head_dim=hd),
        out_shape=(
            jax.ShapeDtypeStruct((B, n_heads, T, hd), bf16),
            jax.ShapeDtypeStruct((B, n_heads, T, hd), bf16),
            jax.ShapeDtypeStruct((B, n_heads, T, hd), bf16),
        ),
        grid_spec=pltpu.PrefetchScalarGridSpec(
            num_scalar_prefetch=0,
            grid=(B, T // tp),
            in_specs=[
                pl.BlockSpec((1, tp, C), lambda b, i: (b, i, 0)),   # x tile
                pl.BlockSpec((1, C), lambda b, i: (0, 0)),          # ln1 gamma
                pl.BlockSpec((1, C), lambda b, i: (0, 0)),          # ln1 beta
                pl.BlockSpec((C, C), lambda b, i: (0, 0)),          # Wq (bf16)
                pl.BlockSpec((1, C), lambda b, i: (0, 0)),          # bq
                pl.BlockSpec((C, C), lambda b, i: (0, 0)),          # Wk
                pl.BlockSpec((1, C), lambda b, i: (0, 0)),          # bk
                pl.BlockSpec((C, C), lambda b, i: (0, 0)),          # Wv
                pl.BlockSpec((1, C), lambda b, i: (0, 0)),          # bv
            ],
            out_specs=(
                pl.BlockSpec((1, n_heads, tp, hd), lambda b, i: (b, 0, i, 0)),
                pl.BlockSpec((1, n_heads, tp, hd), lambda b, i: (b, 0, i, 0)),
                pl.BlockSpec((1, n_heads, tp, hd), lambda b, i: (b, 0, i, 0)),
            ),
        ),
        compiler_params=pltpu.CompilerParams(
            dimension_semantics=("parallel", "parallel"),
            vmem_limit_bytes=_VMEM_LIMIT),
    )
    q, k, v = qkv_call(x, row(ln1_g), row(ln1_b),
                       wq.astype(bf16), row(bq),
                       wk.astype(bf16), row(bk),
                       wv.astype(bf16), row(bv))

    # ---------------- Kernel 2: attention + residual + FFN ------------------
    tq = _pick_tile(T, 128)
    tkv = _pick_tile(T, 128)

    if mask is None:
        mask3 = jnp.zeros((1, T, T), jnp.int32)
        mask_map = lambda b, qi, ki: (0, qi, ki)
    elif mask.ndim == 2:                                    # shared (T, T) mask
        mask3 = mask.reshape(1, T, T)
        mask_map = lambda b, qi, ki: (0, qi, ki)
    else:                                                   # per-batch (B, T, T)
        mask3 = mask
        mask_map = lambda b, qi, ki: (b, qi, ki)

    # TODO(synk): for very large C/ffn on v7x (64 MiB VMEM) the constant-index
    # weight blocks could additionally be single-buffered (pl.Buffered(1) /
    # pl.ANY + one-time copy); bf16 weights already halve their footprint.
    out = pl.pallas_call(
        functools.partial(_attn_ffn_kernel, n_heads=n_heads, head_dim=hd),
        out_shape=jax.ShapeDtypeStruct((B, T, C), x.dtype),
        grid_spec=pltpu.PrefetchScalarGridSpec(
            num_scalar_prefetch=0,
            grid=(B, T // tq, T // tkv),
            in_specs=[
                pl.BlockSpec((1, tq, tkv), mask_map),                               # mask
                pl.BlockSpec((1, tq, C), lambda b, qi, ki: (b, qi, 0)),              # x (residual)
                pl.BlockSpec((1, n_heads, tq, hd), lambda b, qi, ki: (b, 0, qi, 0)),   # q
                pl.BlockSpec((1, n_heads, tkv, hd), lambda b, qi, ki: (b, 0, ki, 0)),  # k
                pl.BlockSpec((1, n_heads, tkv, hd), lambda b, qi, ki: (b, 0, ki, 0)),  # v
                pl.BlockSpec((1, C), lambda b, qi, ki: (0, 0)),                      # ln2 gamma
                pl.BlockSpec((1, C), lambda b, qi, ki: (0, 0)),                      # ln2 beta
                pl.BlockSpec((C, ffn), lambda b, qi, ki: (0, 0)),                    # W1 (bf16)
                pl.BlockSpec((1, ffn), lambda b, qi, ki: (0, 0)),                    # b1
                pl.BlockSpec((ffn, C), lambda b, qi, ki: (0, 0)),                    # W2 (bf16)
                pl.BlockSpec((1, C), lambda b, qi, ki: (0, 0)),                      # b2
            ],
            out_specs=pl.BlockSpec((1, tq, C), lambda b, qi, ki: (b, qi, 0)),
            scratch_shapes=[
                pltpu.VMEM((n_heads, tq, 1), jnp.float32),   # running max
                pltpu.VMEM((n_heads, tq, 1), jnp.float32),   # running sum
                pltpu.VMEM((n_heads, tq, hd), jnp.float32),  # accumulator
            ],
        ),
        compiler_params=pltpu.CompilerParams(
            dimension_semantics=("parallel", "parallel", "arbitrary"),
            vmem_limit_bytes=_VMEM_LIMIT),
    )(mask3, x, q, k, v,
      row(ln2_g), row(ln2_b),
      w1.astype(bf16), row(b1),
      w2.astype(bf16), row(b2))
    return out


if __name__ == "__main__":
    B, T, C, H, FFN = 2, 8, 32, 4, 64
    key = jax.random.PRNGKey(0)
    keys = jax.random.split(key, 8)

    def lin_init(k, fan_in, fan_out):
        # mimic PyTorch nn.Linear default init; weight stored as (in, out)
        bound = 1.0 / (fan_in ** 0.5)
        kw, kb = jax.random.split(k)
        w = jax.random.uniform(kw, (fan_in, fan_out), jnp.float32, -bound, bound)
        b = jax.random.uniform(kb, (fan_out,), jnp.float32, -bound, bound)
        return w, b

    wq, bq = lin_init(keys[0], C, C)
    wk, bk = lin_init(keys[1], C, C)
    wv, bv = lin_init(keys[2], C, C)
    w1, b1 = lin_init(keys[3], C, FFN)
    w2, b2 = lin_init(keys[4], FFN, C)
    ln1_g = jnp.ones((C,), jnp.float32)
    ln1_b = jnp.zeros((C,), jnp.float32)
    ln2_g = jnp.ones((C,), jnp.float32)
    ln2_b = jnp.zeros((C,), jnp.float32)

    x = jax.random.normal(keys[5], (B, T, C), jnp.float32)
    # shared causal mask (T, T): 1 == masked future position
    mask = (jnp.arange(T)[None, :] > jnp.arange(T)[:, None]).astype(jnp.int32)

    params = (ln1_g, ln1_b, wq, bq, wk, bk, wv, bv,
              ln2_g, ln2_b, w1, b1, w2, b2)

    out = transformer_block(x, mask, params, n_heads=H)
    out = jax.block_until_ready(out)

    # ---- pure-JAX f32 reference for validation ----
    def ref(x, mask):
        def ln(v, g, b):
            mu = v.mean(-1, keepdims=True)
            var = ((v - mu) ** 2).mean(-1, keepdims=True)
            return (v - mu) / jnp.sqrt(var + 1e-5) * g + b
        hd = C // H
        x1 = ln(x, ln1_g, ln1_b)
        q = x1 @ wq + bq
        k = x1 @ wk + bk
        v = x1 @ wv + bv
        qh = q.reshape(B, T, H, hd).transpose(0, 2, 1, 3)
        kh = k.reshape(B, T, H, hd).transpose(0, 2, 1, 3)
        vh = v.reshape(B, T, H, hd).transpose(0, 2, 1, 3)
        s = jnp.einsum('bhqd,bhkd->bhqk', qh, kh) / jnp.sqrt(jnp.float32(hd))
        s = jnp.where(mask[None, None] != 0, -1e10, s)
        p = jax.nn.softmax(s, axis=-1)
        o = jnp.einsum('bhqk,bhkd->bhqd', p, vh).transpose(0, 2, 1, 3)
        o = o.reshape(B, T, C)
        xo = x + o
        x2 = ln(xo, ln2_g, ln2_b)
        h1 = jnp.maximum(x2 @ w1 + b1, 0.0)
        return xo + h1 @ w2 + b2

    expected = ref(x, mask)
    # bf16 MXU inputs + approx reciprocal -> loosened tolerance vs f32 reference
    assert jnp.allclose(out, expected, atol=3e-2, rtol=3e-2), \
        float(jnp.max(jnp.abs(out - expected)))
    print("KERNEL_OK")
</pallas_src>

<mosaic_0001>
module attributes {stable_mosaic.version = 11 : i64} {
  func.func @_qkv_kernel(%arg0: i32, %arg1: i32, %arg2: memref<1x8x32xf32, #tpu.memory_space<vmem>>, %arg3: memref<1x32xf32, #tpu.memory_space<vmem>>, %arg4: memref<1x32xf32, #tpu.memory_space<vmem>>, %arg5: memref<32x32xbf16, #tpu.memory_space<vmem>>, %arg6: memref<1x32xf32, #tpu.memory_space<vmem>>, %arg7: memref<32x32xbf16, #tpu.memory_space<vmem>>, %arg8: memref<1x32xf32, #tpu.memory_space<vmem>>, %arg9: memref<32x32xbf16, #tpu.memory_space<vmem>>, %arg10: memref<1x32xf32, #tpu.memory_space<vmem>>, %arg11: memref<1x4x8x8xbf16, #tpu.memory_space<vmem>>, %arg12: memref<1x4x8x8xbf16, #tpu.memory_space<vmem>>, %arg13: memref<1x4x8x8xbf16, #tpu.memory_space<vmem>>) attributes {dimension_semantics = [#tpu.dimension_semantics<parallel>, #tpu.dimension_semantics<parallel>], iteration_bounds = array<i64: 2, 1>, scalar_prefetch = 0 : i64, scratch_operands = 0 : i64, tpu.core_type = #tpu.core_type<tc>, window_params = [{transform_indices = @transform_0, window_bounds = array<i64: 1, 8, 32>}, {pipeline_mode = #tpu.pipeline_mode<synchronous>, transform_indices = @transform_1, window_bounds = array<i64: 1, 32>}, {pipeline_mode = #tpu.pipeline_mode<synchronous>, transform_indices = @transform_2, window_bounds = array<i64: 1, 32>}, {pipeline_mode = #tpu.pipeline_mode<synchronous>, transform_indices = @transform_3, window_bounds = array<i64: 32, 32>}, {pipeline_mode = #tpu.pipeline_mode<synchronous>, transform_indices = @transform_4, window_bounds = array<i64: 1, 32>}, {pipeline_mode = #tpu.pipeline_mode<synchronous>, transform_indices = @transform_5, window_bounds = array<i64: 32, 32>}, {pipeline_mode = #tpu.pipeline_mode<synchronous>, transform_indices = @transform_6, window_bounds = array<i64: 1, 32>}, {pipeline_mode = #tpu.pipeline_mode<synchronous>, transform_indices = @transform_7, window_bounds = array<i64: 32, 32>}, {pipeline_mode = #tpu.pipeline_mode<synchronous>, transform_indices = @transform_8, window_bounds = array<i64: 1, 32>}, {transform_indices = @transform_9, window_bounds = array<i64: 1, 4, 8, 8>}, {transform_indices = @transform_10, window_bounds = array<i64: 1, 4, 8, 8>}, {transform_indices = @transform_11, window_bounds = array<i64: 1, 4, 8, 8>}]} {
    %c0 = arith.constant 0 : index
    %c0_0 = arith.constant 0 : index
    %c0_1 = arith.constant 0 : index
    %0 = vector.load %arg2[%c0, %c0_0, %c0_1] : memref<1x8x32xf32, #tpu.memory_space<vmem>>, vector<1x8x32xf32>
    %1 = vector.shape_cast %0 : vector<1x8x32xf32> to vector<8x32xf32>
    %c0_2 = arith.constant 0 : index
    %c0_3 = arith.constant 0 : index
    %2 = vector.load %arg3[%c0_2, %c0_3] : memref<1x32xf32, #tpu.memory_space<vmem>>, vector<1x32xf32>
    %3 = vector.shape_cast %2 : vector<1x32xf32> to vector<32xf32>
    %c0_4 = arith.constant 0 : index
    %c0_5 = arith.constant 0 : index
    %4 = vector.load %arg4[%c0_4, %c0_5] : memref<1x32xf32, #tpu.memory_space<vmem>>, vector<1x32xf32>
    %5 = vector.shape_cast %4 : vector<1x32xf32> to vector<32xf32>
    %cst = arith.constant dense<0.000000e+00> : vector<8xf32>
    %6 = vector.multi_reduction <add>, %1, %cst [1] : vector<8x32xf32> to vector<8xf32>
    %7 = vector.shape_cast %6 : vector<8xf32> to vector<8x1xf32>
    %cst_6 = arith.constant 3.200000e+01 : f32
    %8 = vector.broadcast %cst_6 : f32 to vector<8x1xf32>
    %9 = arith.divf %7, %8 : vector<8x1xf32>
    %10 = vector.broadcast %9 : vector<8x1xf32> to vector<8x32xf32>
    %11 = arith.subf %1, %10 : vector<8x32xf32>
    %12 = arith.mulf %11, %11 : vector<8x32xf32>
    %cst_7 = arith.constant dense<0.000000e+00> : vector<8xf32>
    %13 = vector.multi_reduction <add>, %12, %cst_7 [1] : vector<8x32xf32> to vector<8xf32>
    %14 = vector.shape_cast %13 : vector<8xf32> to vector<8x1xf32>
    %cst_8 = arith.constant 3.200000e+01 : f32
    %15 = vector.broadcast %cst_8 : f32 to vector<8x1xf32>
    %16 = arith.divf %14, %15 : vector<8x1xf32>
    %17 = vector.broadcast %9 : vector<8x1xf32> to vector<8x32xf32>
    %18 = arith.subf %1, %17 : vector<8x32xf32>
    %cst_9 = arith.constant 9.99999974E-6 : f32
    %19 = vector.broadcast %cst_9 : f32 to vector<8x1xf32>
    %20 = arith.addf %16, %19 : vector<8x1xf32>
    %21 = math.rsqrt %20 : vector<8x1xf32>
    %22 = vector.broadcast %21 : vector<8x1xf32> to vector<8x32xf32>
    %23 = arith.mulf %18, %22 : vector<8x32xf32>
    %24 = vector.shape_cast %3 : vector<32xf32> to vector<1x32xf32>
    %25 = vector.broadcast %24 : vector<1x32xf32> to vector<8x32xf32>
    %26 = arith.mulf %23, %25 : vector<8x32xf32>
    %27 = vector.shape_cast %5 : vector<32xf32> to vector<1x32xf32>
    %28 = vector.broadcast %27 : vector<1x32xf32> to vector<8x32xf32>
    %29 = arith.addf %26, %28 : vector<8x32xf32>
    %30 = arith.truncf %29 : vector<8x32xf32> to vector<8x32xbf16>
    %c0_10 = arith.constant 0 : index
    %c0_11 = arith.constant 0 : index
    %31 = vector.load %arg5[%c0_10, %c0_11] : memref<32x32xbf16, #tpu.memory_space<vmem>>, vector<32x32xbf16>
    %cst_12 = arith.constant dense<0.000000e+00> : vector<8x32xf32>
    %32 = tpu.matmul %30, %31, %cst_12 {dimension_numbers = #tpu.dot_dimension_numbers<[1], [0], [0], [1], [0, 0, 1, 1], [], []>} : vector<8x32xbf16>, vector<32x32xbf16>, vector<8x32xf32> -> vector<8x32xf32>
    %c0_13 = arith.constant 0 : index
    %c0_14 = arith.constant 0 : index
    %33 = vector.load %arg6[%c0_13, %c0_14] : memref<1x32xf32, #tpu.memory_space<vmem>>, vector<1x32xf32>
    %34 = vector.shape_cast %33 : vector<1x32xf32> to vector<32xf32>
    %35 = vector.shape_cast %34 : vector<32xf32> to vector<1x32xf32>
    %36 = vector.broadcast %35 : vector<1x32xf32> to vector<8x32xf32>
    %37 = arith.addf %32, %36 : vector<8x32xf32>
    %c0_15 = arith.constant 0 : index
    %c0_16 = arith.constant 0 : index
    %38 = vector.load %arg7[%c0_15, %c0_16] : memref<32x32xbf16, #tpu.memory_space<vmem>>, vector<32x32xbf16>
    %cst_17 = arith.constant dense<0.000000e+00> : vector<8x32xf32>
    %39 = tpu.matmul %30, %38, %cst_17 {dimension_numbers = #tpu.dot_dimension_numbers<[1], [0], [0], [1], [0, 0, 1, 1], [], []>} : vector<8x32xbf16>, vector<32x32xbf16>, vector<8x32xf32> -> vector<8x32xf32>
    %c0_18 = arith.constant 0 : index
    %c0_19 = arith.constant 0 : index
    %40 = vector.load %arg8[%c0_18, %c0_19] : memref<1x32xf32, #tpu.memory_space<vmem>>, vector<1x32xf32>
    %41 = vector.shape_cast %40 : vector<1x32xf32> to vector<32xf32>
    %42 = vector.shape_cast %41 : vector<32xf32> to vector<1x32xf32>
    %43 = vector.broadcast %42 : vector<1x32xf32> to vector<8x32xf32>
    %44 = arith.addf %39, %43 : vector<8x32xf32>
    %c0_20 = arith.constant 0 : index
    %c0_21 = arith.constant 0 : index
    %45 = vector.load %arg9[%c0_20, %c0_21] : memref<32x32xbf16, #tpu.memory_space<vmem>>, vector<32x32xbf16>
    %cst_22 = arith.constant dense<0.000000e+00> : vector<8x32xf32>
    %46 = tpu.matmul %30, %45, %cst_22 {dimension_numbers = #tpu.dot_dimension_numbers<[1], [0], [0], [1], [0, 0, 1, 1], [], []>} : vector<8x32xbf16>, vector<32x32xbf16>, vector<8x32xf32> -> vector<8x32xf32>
    %c0_23 = arith.constant 0 : index
    %c0_24 = arith.constant 0 : index
    %47 = vector.load %arg10[%c0_23, %c0_24] : memref<1x32xf32, #tpu.memory_space<vmem>>, vector<1x32xf32>
    %48 = vector.shape_cast %47 : vector<1x32xf32> to vector<32xf32>
    %49 = vector.shape_cast %48 : vector<32xf32> to vector<1x32xf32>
    %50 = vector.broadcast %49 : vector<1x32xf32> to vector<8x32xf32>
    %51 = arith.addf %46, %50 : vector<8x32xf32>
    %cst_25 = arith.constant 0.353553385 : f32
    %52 = vector.broadcast %cst_25 : f32 to vector<8x32xf32>
    %53 = arith.mulf %37, %52 : vector<8x32xf32>
    %54 = vector.shape_cast %53 : vector<8x32xf32> to vector<8x4x8xf32>
    %55 = tpu.transpose %54, [1, 0, 2] : vector<8x4x8xf32> -> vector<4x8x8xf32>
    %56 = arith.truncf %55 : vector<4x8x8xf32> to vector<4x8x8xbf16>
    %c0_26 = arith.constant 0 : index
    %c0_27 = arith.constant 0 : index
    %c0_28 = arith.constant 0 : index
    %c0_29 = arith.constant 0 : index
    %57 = vector.load %arg11[%c0_26, %c0_27, %c0_28, %c0_29] : memref<1x4x8x8xbf16, #tpu.memory_space<vmem>>, vector<1x4x8x8xbf16>
    %58 = vector.shape_cast %57 : vector<1x4x8x8xbf16> to vector<4x8x8xbf16>
    %59 = vector.shape_cast %56 : vector<4x8x8xbf16> to vector<1x4x8x8xbf16>
    tpu.vector_store %arg11[%c0_26, %c0_27, %c0_28, %c0_29], %59 {strides = array<i32>} : memref<1x4x8x8xbf16, #tpu.memory_space<vmem>>, vector<1x4x8x8xbf16>,
    %60 = vector.shape_cast %44 : vector<8x32xf32> to vector<8x4x8xf32>
    %61 = tpu.transpose %60, [1, 0, 2] : vector<8x4x8xf32> -> vector<4x8x8xf32>
    %62 = arith.truncf %61 : vector<4x8x8xf32> to vector<4x8x8xbf16>
    %c0_30 = arith.constant 0 : index
    %c0_31 = arith.constant 0 : index
    %c0_32 = arith.constant 0 : index
    %c0_33 = arith.constant 0 : index
    %63 = vector.load %arg12[%c0_30, %c0_31, %c0_32, %c0_33] : memref<1x4x8x8xbf16, #tpu.memory_space<vmem>>, vector<1x4x8x8xbf16>
    %64 = vector.shape_cast %63 : vector<1x4x8x8xbf16> to vector<4x8x8xbf16>
    %65 = vector.shape_cast %62 : vector<4x8x8xbf16> to vector<1x4x8x8xbf16>
    tpu.vector_store %arg12[%c0_30, %c0_31, %c0_32, %c0_33], %65 {strides = array<i32>} : memref<1x4x8x8xbf16, #tpu.memory_space<vmem>>, vector<1x4x8x8xbf16>,
    %66 = vector.shape_cast %51 : vector<8x32xf32> to vector<8x4x8xf32>
    %67 = tpu.transpose %66, [1, 0, 2] : vector<8x4x8xf32> -> vector<4x8x8xf32>
    %68 = arith.truncf %67 : vector<4x8x8xf32> to vector<4x8x8xbf16>
    %c0_34 = arith.constant 0 : index
    %c0_35 = arith.constant 0 : index
    %c0_36 = arith.constant 0 : index
    %c0_37 = arith.constant 0 : index
    %69 = vector.load %arg13[%c0_34, %c0_35, %c0_36, %c0_37] : memref<1x4x8x8xbf16, #tpu.memory_space<vmem>>, vector<1x4x8x8xbf16>
    %70 = vector.shape_cast %69 : vector<1x4x8x8xbf16> to vector<4x8x8xbf16>
    %71 = vector.shape_cast %68 : vector<4x8x8xbf16> to vector<1x4x8x8xbf16>
    tpu.vector_store %arg13[%c0_34, %c0_35, %c0_36, %c0_37], %71 {strides = array<i32>} : memref<1x4x8x8xbf16, #tpu.memory_space<vmem>>, vector<1x4x8x8xbf16>,
    return
  }
  func.func @transform_0(%arg0: i32, %arg1: i32) -> (i32, i32, i32) {
    %c0_i32 = arith.constant 0 : i32
    %c0_i32_0 = arith.constant 0 : i32
    return %arg0, %arg1, %c0_i32 : i32, i32, i32
  }
  func.func @transform_1(%arg0: i32, %arg1: i32) -> (i32, i32) {
    %c0_i32 = arith.constant 0 : i32
    %c0_i32_0 = arith.constant 0 : i32
    %c0_i32_1 = arith.constant 0 : i32
    return %c0_i32, %c0_i32_0 : i32, i32
  }
  func.func @transform_2(%arg0: i32, %arg1: i32) -> (i32, i32) {
    %c0_i32 = arith.constant 0 : i32
    %c0_i32_0 = arith.constant 0 : i32
    %c0_i32_1 = arith.constant 0 : i32
    return %c0_i32, %c0_i32_0 : i32, i32
  }
  func.func @transform_3(%arg0: i32, %arg1: i32) -> (i32, i32) {
    %c0_i32 = arith.constant 0 : i32
    %c0_i32_0 = arith.constant 0 : i32
    %c0_i32_1 = arith.constant 0 : i32
    return %c0_i32, %c0_i32_0 : i32, i32
  }
  func.func @transform_4(%arg0: i32, %arg1: i32) -> (i32, i32) {
    %c0_i32 = arith.constant 0 : i32
    %c0_i32_0 = arith.constant 0 : i32
    %c0_i32_1 = arith.constant 0 : i32
    return %c0_i32, %c0_i32_0 : i32, i32
  }
  func.func @transform_5(%arg0: i32, %arg1: i32) -> (i32, i32) {
    %c0_i32 = arith.constant 0 : i32
    %c0_i32_0 = arith.constant 0 : i32
    %c0_i32_1 = arith.constant 0 : i32
    return %c0_i32, %c0_i32_0 : i32, i32
  }
  func.func @transform_6(%arg0: i32, %arg1: i32) -> (i32, i32) {
    %c0_i32 = arith.constant 0 : i32
    %c0_i32_0 = arith.constant 0 : i32
    %c0_i32_1 = arith.constant 0 : i32
    return %c0_i32, %c0_i32_0 : i32, i32
  }
  func.func @transform_7(%arg0: i32, %arg1: i32) -> (i32, i32) {
    %c0_i32 = arith.constant 0 : i32
    %c0_i32_0 = arith.constant 0 : i32
    %c0_i32_1 = arith.constant 0 : i32
    return %c0_i32, %c0_i32_0 : i32, i32
  }
  func.func @transform_8(%arg0: i32, %arg1: i32) -> (i32, i32) {
    %c0_i32 = arith.constant 0 : i32
    %c0_i32_0 = arith.constant 0 : i32
    %c0_i32_1 = arith.constant 0 : i32
    return %c0_i32, %c0_i32_0 : i32, i32
  }
  func.func @transform_9(%arg0: i32, %arg1: i32) -> (i32, i32, i32, i32) {
    %c0_i32 = arith.constant 0 : i32
    %c0_i32_0 = arith.constant 0 : i32
    %c0_i32_1 = arith.constant 0 : i32
    return %arg0, %c0_i32, %arg1, %c0_i32_0 : i32, i32, i32, i32
  }
  func.func @transform_10(%arg0: i32, %arg1: i32) -> (i32, i32, i32, i32) {
    %c0_i32 = arith.constant 0 : i32
    %c0_i32_0 = arith.constant 0 : i32
    %c0_i32_1 = arith.constant 0 : i32
    return %arg0, %c0_i32, %arg1, %c0_i32_0 : i32, i32, i32, i32
  }
  func.func @transform_11(%arg0: i32, %arg1: i32) -> (i32, i32, i32, i32) {
    %c0_i32 = arith.constant 0 : i32
    %c0_i32_0 = arith.constant 0 : i32
    %c0_i32_1 = arith.constant 0 : i32
    return %arg0, %c0_i32, %arg1, %c0_i32_0 : i32, i32, i32, i32
  }
}

</mosaic_0001>

<bundles_post_ra>
// kernel: tpu_custom_call.1
= control target key start
LH: loop header
LB: loop body
LE: loop exit
PB: predicated region body
PF: predicated region fallthrough
CT: control target
= control target key end

     0   :  { %s2332_s0 = inlined_call_operand.hbm [shape: f32[2,8,32], index: 0, kind: input, shape index: {}]   ;;  %s2333_s1 = inlined_call_operand.vmem [shape: f32[1,32], index: 1, kind: input, shape index: {}]   ;;  %s2334_s2 = inlined_call_operand.vmem [shape: f32[1,32], index: 2, kind: input, shape index: {}]   ;;  %s2335_s3 = inlined_call_operand.hbm [shape: bf16[32,32], index: 3, kind: input, shape index: {}]   ;;  %s2336_s4 = inlined_call_operand.vmem [shape: f32[1,32], index: 4, kind: input, shape index: {}]   ;;  %s2337_s5 = inlined_call_operand.hbm [shape: bf16[32,32], index: 5, kind: input, shape index: {}]   ;;  %s2338_s6 = inlined_call_operand.vmem [shape: f32[1,32], index: 6, kind: input, shape index: {}]   ;;  %s2339_s7 = inlined_call_operand.hbm [shape: bf16[32,32], index: 7, kind: input, shape index: {}]   ;;  %s2340_s8 = inlined_call_operand.vmem [shape: f32[1,32], index: 8, kind: input, shape index: {}]   ;;  %s2341_s9 = inlined_call_operand.hbm [shape: bf16[2,4,8,8], index: 9, kind: output, shape index: {0}]   ;;  %s2342_s10 = inlined_call_operand.hbm [shape: bf16[2,4,8,8], index: 10, kind: output, shape index: {1}]   ;;  %s2343_s11 = inlined_call_operand.hbm [shape: bf16[2,4,8,8], index: 11, kind: output, shape index: {2}]  }
   0x1   :  { %2351 = sst [smem:[#allocation22_spill]] %s2335_s3 }
   0x2   :  { %2352 = sst [smem:[#allocation23_spill]] %s2337_s5 }
   0x3   :  { %2353 = sst [smem:[#allocation24_spill]] %s2339_s7 }
   0x4   :  { %2354 = sst [smem:[#allocation25_spill]] %s2343_s11 }
   0x5   :  { %17 = vsyncpa [#allocation3], 0 }
   0x6   :  { %19 = vsyncpa [#allocation3 + $0x1], 0 }
   0x7   :  { %20 = vsyncpa [#allocation6], 0 }
   0x8   :  { %21 = vsyncpa [#allocation9], 0 }
   0x9   :  { %22 = vsyncpa [#allocation4], 0 }
   0xa   :  { %24 = vsyncpa [#allocation4 + $0x1], 0 }
   0xb   :  { %25 = vsyncpa [#allocation12], 0 }
   0xc   :  { %27 = vsyncpa [#allocation12 + $0x1], 0  ;;  %s1948_s17 = smov 0   ;;  %s1950_s18 = smov 0  }
   0xd   :  { %s1952_s19 = smov 0   ;;  %s1954_s20 = smov 0  }
   0xe   :  { %s1956_s21 = smov 0   ;;  %s1958_s22 = smov 0  }
   0xf LB: > { %2355 = sst [smem:[#allocation19_spill]] %s1848_s17  ;;  %s1979_s23 = sadd.s32 4294967295, %s1868_s22   ;;  %s1868_s22 = sphi %s1958_s22, %s33_s22   ;;  %s1864_s21 = sphi %s1956_s21, %s2384_s21   ;;  %s1860_s20 = sphi %s1954_s20, %s2383_s20   ;;  %s1856_s19 = sphi %s1952_s19, %s2382_s19   ;;  %s1852_s18 = sphi %s1950_s18, %s2381_s18   ;;  %s1848_s17 = sphi %s1948_s17, %s2380_s17  }
  0x10   : > { %s2344_s24 = sadd.s32 4294967294, %s1868_s22   ;;  %p67_p0 = scmp.ne.s32.totalorder %s1852_s18, %s1848_s17 }
  0x11   : > { %p2346_p1 = scmp.eq.s32.totalorder %s1979_s23, 0  ;;  %p267_p3 = scmp.eq.s32.totalorder %s2344_s24, 1 }
  0x12   : > { %p1414_p5 = scmp.ge.s32.totalorder %s1868_s22, 1  ;;  %p330_p7 = scmp.lt.s32.totalorder %s1868_s22, 3 }
  0x13   : > { %p1990_p4 = por %p2346_p1, %p67_p0  ;;  %p1995_p6 = por %p267_p3, %p67_p0 }
  0x14   : > { %p2000_p8 = pnand %p1414_p5, %p330_p7  ;;  %s1870_s28 = smov [#allocation5]  }
  0x15   : > { %s2356_s25 = scalar_select %p1990_p4, 1, 0 }
  0x16   : > { %s2357_s26 = scalar_select %p1995_p6, 1, 0 }
  0x17   : > { %s348_s29 = sshll.u32 %s1870_s28, 4  ;;  %p1516_p9 = pneg %p2000_p8  ;;  %s349_s29 = int_to_ptr.vmem [resolvable:$true] %s348_s29 }
  0x18   : > { %2358 = sst [smem:[#allocation20_spill]] %s2357_s26  ;;  %s1871_s12 = smov [#allocation7]  }
  0x19   : > { %p2009_p11 = pnand %p1516_p9, %p2346_p1  ;;  %s364_s13 = sshll.u32 %s1871_s12, 4  ;;  %s365_s13 = int_to_ptr.vmem [resolvable:$true] %s364_s13 }
  0x1a   : > { %s1872_s14 = smov [#allocation8]   ;;  %s1629_s16 = scalar_lea.vmem %s349_s29, 256 }
  0x1b   : > { %s380_s15 = sshll.u32 %s1872_s14, 4  ;;  %p1620_p12 = pneg %p2009_p11  ;;  %s381_s15 = int_to_ptr.vmem [resolvable:$true] %s380_s15 }
  0x1c   : > { %p1630_p13 = scmp.ne.s32.totalorder %s349_s29, %s1629_s16  ;;  %p1637_p5 = scmp.lt.s32.totalorder %s349_s29, %s349_s29 }
  0x1d   : > { %p1638_p7 = scmp.lt.s32.totalorder %s1629_s16, %s1629_s16 }
  0x1e   : > { %p1632_p0 = pnand %p1630_p13, %p1620_p12 }
  0x1f   : > { %p1639_p9 = por %p1638_p7, %p1637_p5 }
  0x20   : > { %p1633_p3 = pneg %p1632_p0 }
  0x22   : > { %p1640_p10 = pnand %p1639_p9, %p1633_p3 }
  0x24   : > { %1643 = shalt.err (!%p1640_p10)
}
  0x25   : > { %s1873_s28 = smov 64   ;;  %s1874_s12 = smov 4  }
  0x26   : > { %s2361_s3 = sld [smem:[#allocation22_spill]]  ;;  %s1655_s26 = scalar_lea.vmem %s365_s13, 256 }
  0x27   : > { %p1656_p1 = scmp.ne.s32.totalorder %s365_s13, %s1655_s26  ;;  %p1663_p2 = scmp.lt.s32.totalorder %s365_s13, %s365_s13 }
  0x28   : > { %p1664_p6 = scmp.lt.s32.totalorder %s1655_s26, %s1655_s26 }
  0x29   : > { %p1658_p13 = pnand %p1656_p1, %p1620_p12 }
  0x2a   : > { %p1665_p5 = por %p1664_p6, %p1663_p2 }
  0x2b   : > { %p1659_p0 = pneg %p1658_p13 }
  0x2c   : > { %1519 = dma.hbm_to_vmem [thread:$0]  (!%p2009_p11), %s2361_s3, 256, %s349_s29, [#allocation6], %s1873_s28, %s1873_s28, %s1874_s12  }
  0x2d   : > { %p1666_p3 = pnand %p1665_p5, %p1659_p0 }
  0x2f   : > { %1669 = shalt.err (!%p1666_p3)
}
  0x30   : > { %s2362_s5 = sld [smem:[#allocation23_spill]]  ;;  %s1681_s24 = scalar_lea.vmem %s381_s15, 256 }
  0x31   : > { %p1682_p10 = scmp.ne.s32.totalorder %s381_s15, %s1681_s24  ;;  %p1689_p9 = scmp.lt.s32.totalorder %s381_s15, %s381_s15 }
  0x32   : > { %p1690_p13 = scmp.lt.s32.totalorder %s1681_s24, %s1681_s24 }
  0x33   : > { %p1684_p7 = pnand %p1682_p10, %p1620_p12 }
  0x34   : > { %p1691_p4 = por %p1690_p13, %p1689_p9 }
  0x35   : > { %p1685_p1 = pneg %p1684_p7 }
  0x36   : > { %1522 = dma.hbm_to_vmem [thread:$0]  (!%p2009_p11), %s2362_s5, 256, %s365_s13, [#allocation6], %s1873_s28, %s1873_s28, %s1874_s12  }
  0x37   : > { %p1692_p2 = pnand %p1691_p4, %p1685_p1 }
  0x39   : > { %1695 = shalt.err (!%p1692_p2)
}
  0x3a   : > { %s2363_s7 = sld [smem:[#allocation24_spill]]  ;;  %s54_s17 = sadd.s32 1, %s1856_s19 }
  0x3b   : > { %s45_s13 = sadd.s32 1, %s1864_s21  ;;  %p61_p4 = scmp.ne.s32.totalorder %s1856_s19, %s1852_s18 }
  0x3c   : > { %p47_p6 = scmp.ge.s32.totalorder %s45_s13, 2  ;;  %p62_p12 = scmp.eq.s32.totalorder %s1868_s22, 0 }
  0x3d   : > { %p2364_p0 = scmp.eq.s32.totalorder %s1979_s23, 1  ;;  %p1543_p3 = scmp.lt.s32.totalorder %s1868_s22, 2 }
  0x3e   : > { %s2386_s13 = smov (%p47_p6, %s45_s13), 0  ;;  %p63_p10 = por %p62_p12, %p61_p4 }
  0x3f   : > { %p2046_p5 = por %p2364_p0, %p61_p4  ;;  %2366 = sst [smem:[#allocation21_spill]] %s2386_s13 }
  0x40   : > { %1525 = dma.hbm_to_vmem [thread:$0]  (!%p2009_p11), %s2363_s7, 256, %s381_s15, [#allocation9], %s1873_s28, %s1873_s28, %s1874_s12  }
  0x41   : > { %s397_s14 = sand.u32 1, %s1856_s19   ;;  %s49_s16 = ssub.s32 %s1864_s21, %s2386_s13 }
  0x42   : > { %p52_p7 = scmp.eq.s32.totalorder %s49_s16, 0  ;;  %s1419_s15 = sshll.u32 %s397_s14, 3 }
  0x43   : > { %s1420_s28 = sshll.u32 %s1864_s21, 7  ;;  %s401_s3 = scalar_lea.vmem [#allocation2], %s1419_s15 }
  0x44   : > { %s2058_s12 = scalar_select %p52_p7, %s1856_s19, %s54_s17  }
  0x45   : > { %s407_s29 = scalar_lea.hbm %s2332_s0, %s1420_s28  ;;  %s409_s5 = sshll.u32 %s401_s3, 4  ;;  %s410_s5 = int_to_ptr.vmem [resolvable:$true] %s409_s5 }
  0x46   : > { %p2065_p11 = pnand %p1543_p3, %p63_p10  ;;  %s398_s11 = scalar_lea.sflag [#allocation3], %s397_s14 }
  0x47   : > { %s1709_s16 = scalar_lea.vmem %s410_s5, 128  ;;  %s1875_s17 = smov [#allocation2]  }
  0x48   : > { %p1698_p1 = pneg %p2065_p11  ;;  %p1710_p9 = scmp.ne.s32.totalorder %s410_s5, %s1709_s16 }
  0x49   : > { %s1714_s13 = sshll.u32 %s1875_s17, 4  ;;  %s1715_s13 = int_to_ptr.vmem [resolvable:$false] %s1714_s13 }
  0x4a   : > { %p1712_p13 = pnand %p1710_p9, %p1698_p1  ;;  %s1716_s28 = scalar_lea.vmem %s1715_s13, 256 }
  0x4b   : > { %p1717_p4 = scmp.lt.s32.totalorder %s410_s5, %s1715_s13  ;;  %p1718_p6 = scmp.lt.s32.totalorder %s1716_s28, %s1709_s16 }
  0x4c   : > { %p1713_p2 = pneg %p1712_p13 }
  0x4d   : > { %p1719_p12 = por %p1718_p6, %p1717_p4 }
  0x4f   : > { %p1720_p0 = pnand %p1719_p12, %p1713_p2 }
  0x51   : > { %1723 = shalt.err (!%p1720_p0)
}
  0x52   : > { %1529 = dma.hbm_to_vmem [thread:$0]  (!%p2065_p11), %s407_s29, 128, %s410_s5, %s398_s11  }
  0x53   : > { %418 = sbr.rel (%p2000_p8) target bundleno = 808 (0x328), region = 56  ;;  %s2076_s3 = sand.u32 (!%p2000_p8), 1, %s1852_s18  }
  0x54   : > { %s1422_s14 = sshll.u32 (!%p2000_p8), %s2076_s3, 3  ;;  %s421_s15 = scalar_lea.sflag (!%p2000_p8), [#allocation3], %s2076_s3 }
  0x55   : > { %s424_s24 = scalar_lea.vmem (!%p2000_p8), [#allocation2], %s1422_s14  ;;  %p2368_p3 = scmp.ne.s32.totalorder (!%p2000_p8), %s2356_s25, 0 }
  0x58   : > { %1827 = dma.done.wait (%p2368_p3), %s421_s15, 128  }
  0x59   : > { %1829 = vsyncadd (%p2368_p3), %s421_s15, 4294967168  ;;  %p2369_p10 = scmp.eq.s32.totalorder %s1979_s23, 0 }
  0x5b   : > { %1831 = dma.done.wait (%p2369_p10), [#allocation6], 512   ;;  %p2370_p7 = pmov %p2369_p10 }
  0x5d   : > { %1833 = vsyncadd (%p2370_p7), [#allocation6], 4294966784  ;;  %p2371_p8 = pmov %p2370_p7 }
  0x5e   : > { %p2372_p11 = pmov %p2370_p7 }
  0x5f   : > { %1835 = dma.done.wait (%p2371_p8), [#allocation9], 256  }
  0x60   : > { %1837 = vsyncadd (%p2372_p11), [#allocation9], 4294967040  ;;  %vm489_vm0 = vcmask 261120   ;;  %v486_v0 = vld [vmem:[%s424_s24] sm:$0xff]  ;;  %v1610_v7 = vld [vmem:[#allocation5 + $0x8] sm:$0xff]   ;;  %v1876_v9 = vmov 0.0   ;;  %v727_v45 = vlaneseq }
  0x61   : > { %v490_v1 = vsel %vm489_vm0, %v486_v0, 0.0  ;;  %v1611_v8 = vld [vmem:[#allocation7 + $0x8] sm:$0xff]   ;;  %1472 = vmatprep.subr.bf16.mxu0 %v1876_v9  ;;  %1480 = vmatprep.subr.bf16.mxu1 %v1876_v9  ;;  %v1612_v10 = vld [vmem:[#allocation5] sm:$0xff]   ;;  %v1613_v11 = vld [vmem:[#allocation7] sm:$0xff]   ;;  %vm1877_vm1 = vmmov 0   ;;  %s1878_s16 = smov 104  }
  0x62   : > { %491 = vadd.xlane.f32.xlu0 %v490_v1  ;;  %1473 = vmatpush3.bf16.msra.mxu0 %v1610_v7  ;;  %v1429_v16 = vld [vmem:[%s2333_s1] ss:$0 sm:$0xff]  ;;  %v1614_v21 = vld [vmem:[#allocation8 + $0x8] sm:$0xff]   ;;  %v1615_v23 = vld [vmem:[#allocation8] sm:$0xff]   ;;  %s1879_s17 = smov 120   ;;  %s1880_s28 = smov 112  }
  0x63   : > { %1481 = vmatpush3.bf16.msra.mxu1 %v1611_v8  ;;  %1474 = vmatprep.subr.bf16.mxu0 %v1876_v9  ;;  %v1430_v18 = vld [vmem:[%s2334_s2] ss:$0 sm:$0xff]  ;;  %v1881_v43 = vmov 1983009808   ;;  %v1882_v46 = vmov 1934713408  }
  0x64   : > { %1482 = vmatprep.subr.bf16.mxu1 %v1876_v9  ;;  %1476 = vmatprep.mubr.msk.bf16.mxu0 %vm1877_vm1, %v1876_v9  ;;  %v1435_v24 = vld [vmem:[%s2338_s6] ss:$0 sm:$0xff]  ;;  %v725_v44 = vunpack.c.l.s4 %v1881_v43  ;;  %v757_v47 = vunpack.c.l.s4 %v1882_v46  ;;  %v728_v49 = vshrl.u32 %v727_v45, 7  ;;  %s2144_s24 = sshll.u32 %s2076_s3, 4  ;;  %vm862_vm2 = vcmask 60416   ;;  %s1180_s5 = sand.u32 1, %s1979_s23  }
  0x65   : > { %1484 = vmatprep.mubr.msk.bf16.mxu1 %vm1877_vm1, %v1876_v9  ;;  %v1431_v28 = vld [vmem:[%s2336_s4] ss:$0 sm:$0xff]  ;;  %s2158_s7 = sshll.u32 %s1860_s20, 8  ;;  %s477_s11 = scalar_lea.vmem [#allocation11], %s2144_s24 }
  0x66   : > { %1475 = vmatpush3.bf16.msra.mxu0 %v1612_v10  ;;  %v1439_v41 = vld [vmem:[%s2340_s8] ss:$0 sm:$0xff]  ;;  %v726_v48 = vunpack.c.0.s8 %v725_v44  ;;  %v758_v52 = vunpack.c.0.s8 %v757_v47  ;;  %s1217_s25 = sshll.u32 %s477_s11, 4  ;;  %s2165_s20 = scalar_lea.hbm %s2342_s10, %s2158_s7  ;;  %s2167_s25 = int_to_ptr.vmem [resolvable:$true] %s1217_s25 }
  0x67   : > { %1483 = vmatpush3.bf16.msra.mxu1 %v1613_v11  ;;  %1488 = vmatprep.subr.bf16.mxu0 %v1876_v9  ;;  %s2179_s26 = scalar_lea.sflag [#allocation12], %s1180_s5  ;;  %s1724_s29 = scalar_lea.vmem %s2167_s25, 256 }
  0x68   : > { %v2125_v53 = vsub.s32 %v726_v48, %v728_v49  ;;  %v2127_v59 = vsub.s32 %v758_v52, %v728_v49  ;;  %p1725_p1 = scmp.ne.s32.totalorder %s2167_s25, %s1724_s29 }
  0x6a   : > { %p1726_p9 = pnand %p1725_p1, %p2046_p5 }
  0x6c   : > { %p1727_p13 = pneg %p1726_p9 }
  0xeb   : > { %v492_v2 = vpop.xlane.xlu0 %491 }
  0xec   : > { %v494_v3 = vmul.f32 0.03125, %v492_v2 }
  0xee   : > { %v495_v4 = vsub.f32 %v486_v0, %v494_v3 }
  0xf0   : > { %v496_v5 = vmul.f32 %v495_v4, %v495_v4 }
  0xf2   : > { %v497_v6 = vsel %vm489_vm0, %v496_v5, 0.0 }
  0xf3   : > { %498 = vadd.xlane.f32.xlu0 %v497_v6 }
 0x17c   : > { %v499_v12 = vpop.xlane.xlu0 %498 }
 0x17d   : > { %v500_v13 = vmul.f32 0.03125, %v499_v12 }
 0x17f   : > { %v501_v14 = vadd.f32 1e-05, %v500_v13 }
 0x181   : > { %1616 = vrsqrt.f32 %v501_v14 }
 0x18e   : > { %v1617_v15 = vpop.eup %1616 }
 0x18f   : > { %v503_v17 = vmul.f32 %v1617_v15, %v495_v4 }
 0x191   : > { %v510_v19 = vmul.f32 %v1429_v16, %v503_v17 }
 0x193   : > { %v517_v20 = vadd.f32 %v1430_v18, %v510_v19 }
 0x195   : > { %v518_v22 = vpack.c.bf16 %v517_v20, %v517_v20 }
 0x197   : > { %1477 = vmatmul.mubr.msk.bf16.vlgmr.msra.gmra.mxu0 %vm489_vm0, %v518_v22  ;;  %1485 = vmatmul.mubr.msk.bf16.vlgmr.msra.gmra.mxu1 %vm489_vm0, %v518_v22 }
 0x198   : > { %1489 = vmatpush3.bf16.msra.mxu0 %v1614_v21  ;;  %1492 = vmatprep.mubr.msk.bf16.mxu0 %vm1877_vm1, %v1876_v9 }
 0x199   : > { %1490 = vmatprep.subr.bf16.mxu0 %v1876_v9 }
 0x19c   : > { %1491 = vmatpush3.bf16.msra.mxu0 %v1615_v23 }
 0x19f   : > { %1493 = vmatmul.mubr.msk.bf16.vlgmr.msra.gmra.mxu0 %vm489_vm0, %v518_v22 }
 0x257   : > { %v579_v25 = vpop.f32.mrf.mxu0  ;;  %v642_v26 = vpop.f32.mrf.mxu1 }
 0x258   : > { %v643_v27 = vadd.f32 %v1435_v24, %v642_v26  ;;  %v580_v33 = vadd.f32 %v1431_v28, %v579_v25 }
 0x259   : > { %v1478_v29 = vpop.f32.mrf.mxu0  ;;  %v1486_v30 = vpop.f32.mrf.mxu1 }
 0x25a   : > { %874 = vrot.lane.b32.xlu0 %v643_v27, %s1878_s16  ;;  %868 = vrot.lane.b32.xlu1 %v643_v27, %s1879_s17  ;;  %v2112_v37 = vmul.f32 0.35355338, %v580_v33 }
 0x25b   : > { %v582_v31 = vpop.f32.mrf.mxu0  ;;  %v645_v32 = vpop.f32.mrf.mxu1 }
 0x25d   : > { %v1479_v34 = vpop.f32.mrf.mxu0  ;;  %v1487_v35 = vpop.f32.mrf.mxu1 }
 0x25e   : > { %871 = vrot.lane.b32.xlu1 %v643_v27, %s1880_s28 }
 0x25f   : > { %v705_v36 = vpop.f32.mrf.mxu0 }
 0x260   : > { %v2120_v42 = vadd.f32 %v1439_v41, %v705_v36 }
 0x261   : > { %v1494_v38 = vpop.f32.mrf.mxu0 }
 0x262   : > { %713 = vrot.lane.b32.xlu1 %v2112_v37, %s1879_s17 }
 0x263   : > { %v708_v39 = vpop.f32.mrf.mxu0 }
 0x265   : > { %v1495_v40 = vpop.f32.mrf.mxu0 }
 0x266   : > { %716 = vrot.lane.b32.xlu1 %v2112_v37, %s1880_s28 }
 0x26a   : > { %719 = vrot.lane.b32.xlu1 %v2112_v37, %s1878_s16 }
 0x26e   : > { %1022 = vrot.lane.b32.xlu1 %v2120_v42, %s1879_s17 }
 0x272   : > { %1025 = vrot.lane.b32.xlu1 %v2120_v42, %s1880_s28 }
 0x276   : > { %1028 = vrot.lane.b32.xlu1 %v2120_v42, %s1878_s16  ;;  %s1883_s16 = smov [#allocation11]  }
 0x277   : > { %s1728_s17 = sshll.u32 %s1883_s16, 4  ;;  %s1729_s17 = int_to_ptr.vmem [resolvable:$false] %s1728_s17 }
 0x278   : > { %s1730_s28 = scalar_lea.vmem %s1729_s17, 512  ;;  %p1731_p2 = scmp.lt.s32.totalorder %s2167_s25, %s1729_s17 }
 0x279   : > { %p1732_p4 = scmp.lt.s32.totalorder %s1730_s28, %s1724_s29 }
 0x27b   : > { %p1733_p6 = por %p1732_p4, %p1731_p2 }
 0x27d   : > { %p1734_p12 = pnand %p1733_p6, %p1727_p13 }
 0x2cc   : > { %v875_v50 = vpop.permute.xlu0 %874  ;;  %v869_v51 = vpop.permute.xlu1 %868 }
 0x2cd   : > { %v893_v54 = vcombine.low %v869_v51, %v875_v50  ;;  %v894_v55 = vcombine.high %v869_v51, %v875_v50 }
 0x2cf   : > { %v901_v60 = vrot.slane %v893_v54, %v2125_v53  ;;  %v908_v61 = vrot.slane %v894_v55, %v2125_v53 }
 0x2d0   : > { %v872_v56 = vpop.permute.xlu1 %871 }
 0x2d1   : > { %v877_v57 = vcombine.low %v643_v27, %v872_v56  ;;  %v878_v58 = vcombine.high %v643_v27, %v872_v56 }
 0x2d3   : > { %v885_v62 = vrot.slane %v877_v57, %v2125_v53  ;;  %v892_v63 = vrot.slane %v878_v58, %v2125_v53 }
 0x2d4   : > { %v714_v0 = vpop.permute.xlu1 %713 }
 0x2d5   : > { %v909_v1 = vcombine.low %v885_v62, %v901_v60  ;;  %v910_v2 = vcombine.high %v885_v62, %v901_v60  ;;  %v925_v3 = vcombine.low %v892_v63, %v908_v61  ;;  %v926_v4 = vcombine.high %v892_v63, %v908_v61 }
 0x2d7   : > { %v917_v5 = vrot.slane %v909_v1, %v2127_v59  ;;  %v924_v6 = vrot.slane %v910_v2, %v2127_v59  ;;  %v933_v7 = vrot.slane %v925_v3, %v2127_v59  ;;  %v940_v8 = vrot.slane %v926_v4, %v2127_v59 }
 0x2d8   : > { %v717_v9 = vpop.permute.xlu1 %716 }
 0x2d9   : > { %v945_v10 = vcombine.low %v917_v5, %v924_v6  ;;  %v1445_v11 = vcombine.high %v917_v5, %v924_v6  ;;  %v961_v12 = vcombine.low %v933_v7, %v940_v8  ;;  %v1446_v13 = vcombine.high %v933_v7, %v940_v8 }
 0x2da   : > { %v722_v18 = vcombine.low %v2112_v37, %v717_v9  ;;  %v723_v19 = vcombine.high %v2112_v37, %v717_v9 }
 0x2db   : > { %v952_v14 = vrot.slane %v945_v10, %v2125_v53  ;;  %v960_v15 = vrot.slane %v1445_v11, %v2125_v53  ;;  %v968_v16 = vrot.slane %v961_v12, %v2125_v53  ;;  %v976_v17 = vrot.slane %v1446_v13, %v2125_v53 }
 0x2dc   : > { %v720_v20 = vpop.permute.xlu1 %719  ;;  %v730_v31 = vrot.slane %v722_v18, %v2125_v53  ;;  %v737_v32 = vrot.slane %v723_v19, %v2125_v53 }
 0x2dd   : > { %v977_v21 = vcombine.low %v952_v14, %v960_v15  ;;  %v978_v22 = vcombine.high %v952_v14, %v960_v15  ;;  %v993_v23 = vcombine.low %v968_v16, %v976_v17  ;;  %v994_v24 = vcombine.high %v968_v16, %v976_v17 }
 0x2de   : > { %v738_v25 = vcombine.low %v714_v0, %v720_v20  ;;  %v739_v26 = vcombine.high %v714_v0, %v720_v20 }
 0x2df   : > { %v985_v27 = vrot.slane %v977_v21, %v2127_v59  ;;  %v992_v28 = vrot.slane %v978_v22, %v2127_v59  ;;  %v1001_v29 = vrot.slane %v993_v23, %v2127_v59  ;;  %v1008_v30 = vrot.slane %v994_v24, %v2127_v59 }
 0x2e0   : > { %v746_v33 = vrot.slane %v738_v25, %v2125_v53  ;;  %v753_v34 = vrot.slane %v739_v26, %v2125_v53  ;;  %v2155_v35 = vpop.permute.xlu1 %1022 }
 0x2e1   : > { %v1009_v36 = vcombine.low %v985_v27, %v1001_v29  ;;  %v1010_v37 = vcombine.high %v985_v27, %v1001_v29  ;;  %v1011_v38 = vcombine.low %v992_v28, %v1008_v30  ;;  %v1012_v39 = vcombine.high %v992_v28, %v1008_v30 }
 0x2e2   : > { %v754_v40 = vcombine.low %v730_v31, %v746_v33  ;;  %v755_v41 = vcombine.high %v730_v31, %v746_v33  ;;  %v770_v43 = vcombine.low %v737_v32, %v753_v34  ;;  %v771_v44 = vcombine.high %v737_v32, %v753_v34 }
 0x2e3   : > { %v1013_v45 = vpack.c.bf16 %v1009_v36, %v1009_v36  ;;  %v1014_v46 = vpack.c.bf16 %v1010_v37, %v1010_v37  ;;  %v1015_v47 = vpack.c.bf16 %v1011_v38, %v1011_v38  ;;  %v1016_v48 = vpack.c.bf16 %v1012_v39, %v1012_v39 }
 0x2e4   : > { %v762_v49 = vrot.slane %v754_v40, %v2127_v59  ;;  %v769_v50 = vrot.slane %v755_v41, %v2127_v59  ;;  %v778_v51 = vrot.slane %v770_v43, %v2127_v59  ;;  %v785_v52 = vrot.slane %v771_v44, %v2127_v59  ;;  %v1026_v54 = vpop.permute.xlu1 %1025 }
 0x2e5   : > { %1017 = vst.msk [vmem:[%s477_s11] sm:$0xf] %vm862_vm2, %v1013_v45  ;;  %1018 = vst.msk [vmem:[%s477_s11 + $0x4] sm:$0xf] %vm862_vm2, %v1014_v46 }
 0x2e6   : > { %1019 = vst.msk [vmem:[%s477_s11 + $0x8] sm:$0xf] %vm862_vm2, %v1015_v47  ;;  %1020 = vst.msk [vmem:[%s477_s11 + $0xc] sm:$0xf] %vm862_vm2, %v1016_v48  ;;  %v790_v55 = vcombine.low %v762_v49, %v769_v50  ;;  %v1443_v56 = vcombine.high %v762_v49, %v769_v50  ;;  %v806_v57 = vcombine.low %v778_v51, %v785_v52 }
 0x2e7   : > { %v1444_v58 = vcombine.high %v778_v51, %v785_v52 }
 0x2e8   : > { %1737 = shalt.err (!%p1734_p12)
}
 0x2e9   : > { %s1738_s23 = scalar_lea.hbm %s2165_s20, 256  ;;  %s1742_s5 = scalar_lea.hbm %s2342_s10, 512 }
 0x2ea   : > { %p1739_p0 = scmp.ne.s32.totalorder %s2165_s20, %s1738_s23  ;;  %p1743_p7 = scmp.lt.s32.totalorder %s2165_s20, %s2342_s10 }
 0x2eb   : > { %p1744_p8 = scmp.lt.s32.totalorder %s1742_s5, %s1738_s23 }
 0x2ec   : > { %p1740_p3 = pnand %p1739_p0, %p2046_p5 }
 0x2ed   : > { %p1745_p11 = por %p1744_p8, %p1743_p7 }
 0x2ee   : > { %p1741_p10 = pneg %p1740_p3 }
 0x2f0   : > { %p1746_p1 = pnand %p1745_p11, %p1741_p10 }
 0x2f2   : > { %1749 = shalt.err (!%p1746_p1)
}
 0x2f3   : > { %s1884_s13 = smov 64   ;;  %s1885_s29 = smov 4   ;;  %v1031_v60 = vcombine.low %v2120_v42, %v1026_v54  ;;  %v1032_v61 = vcombine.high %v2120_v42, %v1026_v54  ;;  %v797_v62 = vrot.slane %v790_v55, %v2125_v53  ;;  %v805_v63 = vrot.slane %v1443_v56, %v2125_v53  ;;  %v1029_v2 = vpop.permute.xlu1 %1028 }
 0x2f4   : > { %1511 = dma.vmem_to_hbm [thread:$0]  (%p2046_p5), %s2167_s25, 256, %s2165_s20, %s2179_s26, %s1884_s13, %s1884_s13, %s1885_s29   ;;  %v813_v0 = vrot.slane %v806_v57, %v2125_v53  ;;  %v821_v1 = vrot.slane %v1444_v58, %v2125_v53  ;;  %v1047_v3 = vcombine.low %v2155_v35, %v1029_v2  ;;  %v1048_v4 = vcombine.high %v2155_v35, %v1029_v2 }
 0x2f5   : > { %v822_v5 = vcombine.low %v797_v62, %v805_v63  ;;  %v823_v6 = vcombine.high %v797_v62, %v805_v63  ;;  %v1039_v42 = vrot.slane %v1031_v60, %v2125_v53  ;;  %v1046_v9 = vrot.slane %v1032_v61, %v2125_v53  ;;  %s470_s25 = scalar_lea.vmem [#allocation10], %s2144_s24  ;;  %s2230_s28 = scalar_lea.hbm %s2341_s9, %s2158_s7 }
 0x2f6   : > { %v838_v7 = vcombine.low %v813_v0, %v821_v1  ;;  %v839_v8 = vcombine.high %v813_v0, %v821_v1  ;;  %v1055_v10 = vrot.slane %v1047_v3, %v2125_v53  ;;  %v1062_v11 = vrot.slane %v1048_v4, %v2125_v53  ;;  %s1200_s20 = sshll.u32 %s470_s25, 4  ;;  %s1176_s23 = scalar_lea.sflag [#allocation4], %s2076_s3  ;;  %s2232_s20 = int_to_ptr.vmem [resolvable:$true] %s1200_s20 }
 0x2f7   : > { %v830_v12 = vrot.slane %v822_v5, %v2127_v59  ;;  %v837_v13 = vrot.slane %v823_v6, %v2127_v59  ;;  %s1750_s14 = scalar_lea.vmem %s2232_s20, 256  ;;  %s1886_s15 = smov [#allocation10]  }
 0x2f8   : > { %v846_v14 = vrot.slane %v838_v7, %v2127_v59  ;;  %v853_v15 = vrot.slane %v839_v8, %v2127_v59  ;;  %v1063_v16 = vcombine.low %v1039_v42, %v1055_v10  ;;  %v1064_v17 = vcombine.high %v1039_v42, %v1055_v10  ;;  %p1751_p9 = scmp.ne.s32.totalorder %s2232_s20, %s1750_s14  ;;  %s1754_s5 = sshll.u32 %s1886_s15, 4  ;;  %s1755_s5 = int_to_ptr.vmem [resolvable:$false] %s1754_s5 }
 0x2f9   : > { %v1079_v18 = vcombine.low %v1046_v9, %v1062_v11  ;;  %v1080_v19 = vcombine.high %v1046_v9, %v1062_v11  ;;  %s1756_s11 = scalar_lea.vmem %s1755_s5, 512  ;;  %p1757_p4 = scmp.lt.s32.totalorder %s2232_s20, %s1755_s5 }
 0x2fa   : > { %v854_v20 = vcombine.low %v830_v12, %v846_v14  ;;  %v855_v21 = vcombine.high %v830_v12, %v846_v14  ;;  %v856_v22 = vcombine.low %v837_v13, %v853_v15  ;;  %v857_v23 = vcombine.high %v837_v13, %v853_v15  ;;  %p1752_p13 = pnand %p1751_p9, %p2046_p5  ;;  %p1758_p6 = scmp.lt.s32.totalorder %s1756_s11, %s1750_s14 }
 0x2fb   : > { %v1071_v24 = vrot.slane %v1063_v16, %v2127_v59  ;;  %v1078_v25 = vrot.slane %v1064_v17, %v2127_v59  ;;  %v1087_v26 = vrot.slane %v1079_v18, %v2127_v59  ;;  %v1094_v27 = vrot.slane %v1080_v19, %v2127_v59 }
 0x2fc   : > { %v858_v28 = vpack.c.bf16 %v854_v20, %v854_v20  ;;  %v859_v29 = vpack.c.bf16 %v855_v21, %v855_v21  ;;  %v860_v30 = vpack.c.bf16 %v856_v22, %v856_v22  ;;  %v861_v31 = vpack.c.bf16 %v857_v23, %v857_v23  ;;  %p1753_p2 = pneg %p1752_p13  ;;  %p1759_p12 = por %p1758_p6, %p1757_p4 }
 0x2fd   : > { %v1099_v32 = vcombine.low %v1071_v24, %v1078_v25  ;;  %v1447_v33 = vcombine.high %v1071_v24, %v1078_v25  ;;  %v1115_v34 = vcombine.low %v1087_v26, %v1094_v27  ;;  %v1448_v35 = vcombine.high %v1087_v26, %v1094_v27 }
 0x2fe   : > { %863 = vst.msk [vmem:[%s470_s25] sm:$0xf] %vm862_vm2, %v858_v28  ;;  %864 = vst.msk [vmem:[%s470_s25 + $0x4] sm:$0xf] %vm862_vm2, %v859_v29  ;;  %p1760_p0 = pnand %p1759_p12, %p1753_p2 }
 0x2ff   : > { %865 = vst.msk [vmem:[%s470_s25 + $0x8] sm:$0xf] %vm862_vm2, %v860_v30  ;;  %866 = vst.msk [vmem:[%s470_s25 + $0xc] sm:$0xf] %vm862_vm2, %v861_v31  ;;  %v1106_v36 = vrot.slane %v1099_v32, %v2125_v53  ;;  %v1114_v37 = vrot.slane %v1447_v33, %v2125_v53  ;;  %v1122_v38 = vrot.slane %v1115_v34, %v2125_v53 }
 0x300   : > { %v1130_v39 = vrot.slane %v1448_v35, %v2125_v53 }
 0x301   : > { %1763 = shalt.err (!%p1760_p0)
}
 0x302   : > { %s1764_s27 = scalar_lea.hbm %s2230_s28, 256  ;;  %s1768_s16 = scalar_lea.hbm %s2341_s9, 512 }
 0x303   : > { %p1765_p3 = scmp.ne.s32.totalorder %s2230_s28, %s1764_s27  ;;  %p1769_p8 = scmp.lt.s32.totalorder %s2230_s28, %s2341_s9 }
 0x304   : > { %p1770_p11 = scmp.lt.s32.totalorder %s1768_s16, %s1764_s27 }
 0x305   : > { %p1766_p10 = pnand %p1765_p3, %p2046_p5 }
 0x306   : > { %p1771_p1 = por %p1770_p11, %p1769_p8 }
 0x307   : > { %p1767_p7 = pneg %p1766_p10 }
 0x309   : > { %p1772_p9 = pnand %p1771_p1, %p1767_p7 }
 0x30b   : > { %1775 = shalt.err (!%p1772_p9)
}
 0x30c   : > { %1510 = dma.vmem_to_hbm [thread:$0]  (%p2046_p5), %s2232_s20, 256, %s2230_s28, %s1176_s23, %s1884_s13, %s1884_s13, %s1885_s29   ;;  %v1131_v53 = vcombine.low %v1106_v36, %v1114_v37  ;;  %v1132_v40 = vcombine.high %v1106_v36, %v1114_v37  ;;  %v1147_v41 = vcombine.low %v1122_v38, %v1130_v39  ;;  %v1148_v43 = vcombine.high %v1122_v38, %v1130_v39 }
 0x30d   : > { %s484_s14 = scalar_lea.vmem [#allocation13], %s2144_s24  ;;  %s2373_s23 = sld [smem:[#allocation25_spill]] }
 0x30e   : > { %v1139_v44 = vrot.slane %v1131_v53, %v2127_v59  ;;  %v1146_v45 = vrot.slane %v1132_v40, %v2127_v59  ;;  %v1155_v46 = vrot.slane %v1147_v41, %v2127_v59  ;;  %v1162_v47 = vrot.slane %v1148_v43, %v2127_v59  ;;  %s1234_s5 = sshll.u32 %s484_s14, 4  ;;  %s2277_s5 = int_to_ptr.vmem [resolvable:$true] %s1234_s5 }
 0x30f   : > { %s1776_s24 = scalar_lea.vmem %s2277_s5, 256 }
 0x310   : > { %v1163_v48 = vcombine.low %v1139_v44, %v1155_v46  ;;  %v1164_v49 = vcombine.high %v1139_v44, %v1155_v46  ;;  %v1165_v50 = vcombine.low %v1146_v45, %v1162_v47  ;;  %v1166_v51 = vcombine.high %v1146_v45, %v1162_v47  ;;  %p1777_p13 = scmp.ne.s32.totalorder %s2277_s5, %s1776_s24 }
 0x312   : > { %v1167_v52 = vpack.c.bf16 %v1163_v48, %v1163_v48  ;;  %v1168_v54 = vpack.c.bf16 %v1164_v49, %v1164_v49  ;;  %v1169_v55 = vpack.c.bf16 %v1165_v50, %v1165_v50  ;;  %v1170_v56 = vpack.c.bf16 %v1166_v51, %v1166_v51  ;;  %p1778_p2 = pnand %p1777_p13, %p2046_p5 }
 0x313   : > { %s2275_s11 = scalar_lea.hbm %s2373_s23, %s2158_s7  ;;  %s1887_s7 = smov [#allocation13]  }
 0x314   : > { %1171 = vst.msk [vmem:[%s484_s14] sm:$0xf] %vm862_vm2, %v1167_v52  ;;  %1172 = vst.msk [vmem:[%s484_s14 + $0x4] sm:$0xf] %vm862_vm2, %v1168_v54  ;;  %p1779_p4 = pneg %p1778_p2  ;;  %s1780_s27 = sshll.u32 %s1887_s7, 4  ;;  %s1781_s27 = int_to_ptr.vmem [resolvable:$false] %s1780_s27 }
 0x315   : > { %1173 = vst.msk [vmem:[%s484_s14 + $0x8] sm:$0xf] %vm862_vm2, %v1169_v55  ;;  %1174 = vst.msk [vmem:[%s484_s14 + $0xc] sm:$0xf] %vm862_vm2, %v1170_v56  ;;  %s1782_s3 = scalar_lea.vmem %s1781_s27, 512  ;;  %p1783_p6 = scmp.lt.s32.totalorder %s2277_s5, %s1781_s27 }
 0x316   : > { %p1784_p12 = scmp.lt.s32.totalorder %s1782_s3, %s1776_s24 }
 0x318   : > { %p1785_p0 = por %p1784_p12, %p1783_p6 }
 0x31a   : > { %p1786_p3 = pnand %p1785_p0, %p1779_p4 }
 0x31c   : > { %1789 = shalt.err (!%p1786_p3)
}
 0x31d   : > { %s1790_s25 = scalar_lea.hbm %s2275_s11, 256  ;;  %s1794_s15 = scalar_lea.hbm %s2373_s23, 512 }
 0x31e   : > { %p1791_p10 = scmp.ne.s32.totalorder %s2275_s11, %s1790_s25  ;;  %p1795_p11 = scmp.lt.s32.totalorder %s2275_s11, %s2373_s23 }
 0x31f   : > { %p1796_p1 = scmp.lt.s32.totalorder %s1794_s15, %s1790_s25 }
 0x320   : > { %p1792_p7 = pnand %p1791_p10, %p2046_p5 }
 0x321   : > { %p1797_p9 = por %p1796_p1, %p1795_p11 }
 0x322   : > { %p1793_p8 = pneg %p1792_p7 }
 0x324   : > { %p1798_p13 = pnand %p1797_p9, %p1793_p8 }
 0x326   : > { %1801 = shalt.err (!%p1798_p13)
}
 0x327   : > { %1512 = dma.vmem_to_hbm [thread:$0]  (%p2046_p5), %s2277_s5, 256, %s2275_s11, %s2179_s26, %s1884_s13, %s1884_s13, %s1885_s29  }
 0x328 PF: > { %s2374_s28 = sld [smem:[#allocation19_spill]]  ;;  %p2377_p4 = scmp.ge.s32.totalorder %s1868_s22, 2 }
 0x329   : > { %s2375_s24 = sld [smem:[#allocation20_spill]] }
 0x32e   : > { %s1249_s7 = sand.u32 1, %s2374_s28  }
 0x32f   : > { %p2376_p2 = scmp.ne.s32.totalorder %s2375_s24, 0  ;;  %s1250_s27 = scalar_lea.sflag [#allocation4], %s1249_s7 }
 0x331   : > { %p1531_p6 = pnand %p2377_p4, %p2376_p2 }
 0x333   : > { %p1532_p12 = pneg %p1531_p6 }
 0x335   : > { %1839 = dma.done.wait (%p1532_p12), %s1250_s27, 256  }
 0x336   : > { %1841 = vsyncadd (%p1532_p12), %s1250_s27, 4294967040  ;;  %s2378_s30 = sadd.s32 4294967294, %s1868_s22  }
 0x337   : > { %s1258_s3 = sand.u32 1, %s2378_s30  }
 0x338   : > { %s1259_s25 = scalar_lea.sflag [#allocation12], %s1258_s3 }
 0x339   : > { %1843 = dma.done.wait (%p1532_p12), %s1259_s25, 512  }
 0x33a   : > { %1845 = vsyncadd (%p1532_p12), %s1259_s25, 4294966784  ;;  %s33_s22 = sadd.s32 1, %s1868_s22   ;;  %s2379_s26 = sld [smem:[#allocation21_spill]] }
 0x33b   : > { %p30_p5 = scmp.ge.s32.totalorder %s33_s22, 4   ;;  %s2380_s17 = smov %s1852_s18 }
 0x33c   : > { %s2381_s18 = smov %s1856_s19  ;;  %s2382_s19 = smov %s2058_s12 }
 0x33d   : > { %s2383_s20 = smov %s1864_s21  ;;  %32 = sbr.rel (!%p30_p5) target bundleno = 15 (0xf), region = 145 }
 0x340   : > { %s2384_s21 = smov %s2379_s26 }
 0x342   :  { %1273 = vsyncpa [#allocation3], 1 }
 0x343   :  { %1275 = vsyncpa [#allocation3 + $0x1], 1 }
 0x344   :  { %1276 = vsyncpa [#allocation6], 1 }
 0x345   :  { %1277 = vsyncpa [#allocation9], 1 }
 0x346   :  { %1278 = vsyncpa [#allocation4], 1 }
 0x347   :  { %1280 = vsyncpa [#allocation4 + $0x1], 1 }
 0x348   :  { %1281 = vsyncpa [#allocation12], 1 }
 0x349   :  { %1283 = vsyncpa [#allocation12 + $0x1], 1 }

</bundles_post_ra>
